<compile_context>
chip_gen: v7x
topology: tpu7x:2x2x1
jax: 0.10.0
libtpu: 0.0.40
codegen_flags: <defaults>
</compile_context>

<pallas_src>
import functools

import jax
import jax.numpy as jnp
from jax.experimental import pallas as pl
from jax.experimental.pallas import tpu as pltpu


def _round_up(x, m):
    return (x + m - 1) // m * m


def deep_dot_kernel(xs_ref, w1_ref, b1_ref, w2_ref, b2_ref, o_ref, *, tb, batch):
    """One batch tile: fused encode of [x1_tile; x2_tile], partial dot slab out."""
    x = xs_ref[...]                                          # (2*tb, IN_P) bf16

    # Encoder: Linear -> ReLU -> Linear (f32 accumulation on the MXU).
    h = jnp.dot(x, w1_ref[...], preferred_element_type=jnp.float32)
    h = jnp.maximum(h + b1_ref[...], 0.0)                    # f32 elementwise
    z = jnp.dot(h.astype(jnp.bfloat16), w2_ref[...],
                preferred_element_type=jnp.float32) + b2_ref[...]

    z1 = z[:tb]                                              # enc(x1) rows
    z2 = z[tb:]                                              # enc(x2) rows
    prod = z1 * z2                                           # (tb, OUT_P) f32

    # Mask padded batch rows (static check: only emitted if padding exists).
    if batch % tb:
        row = (pl.program_id(0) * tb
               + jax.lax.broadcasted_iota(jnp.int32, prod.shape, 0))
        prod = jnp.where(row < batch, prod, 0.0)

    # Fold sublane groups into a fixed (8, OUT_P) slab: pure VPU adds; the one
    # cross-lane reduction is deferred to the wrapper epilogue.
    o_ref[...] = prod.reshape(tb // 8, 8, prod.shape[-1]).sum(axis=0)


def deep_dot(x1, x2, w1, b1, w2, b2, *, tb=128):
    """dot(enc(x1).ravel(), enc(x2).ravel()) / batch, batch-tiled Pallas kernel."""
    batch, in_dim = x1.shape
    mid = w1.shape[1]
    out_dim = w2.shape[1]
    assert tb % 8 == 0, "batch tile must be a multiple of 8 (sublane alignment)"

    f32, bf16 = jnp.float32, jnp.bfloat16
    in_p = _round_up(in_dim, 128)
    mid_p = _round_up(mid, 128)
    out_p = _round_up(out_dim, 128)
    bp = _round_up(batch, tb)
    nb = bp // tb

    def pad2(a, rows, cols):
        return jnp.pad(a, ((0, rows - a.shape[0]), (0, cols - a.shape[1])))

    # One-time wrapper-side prep (outside the hot loop): pad to lane-dense
    # shapes, stack x1/x2 per tile, cast streamed matmul operands to bf16.
    x1p = pad2(x1.astype(f32), bp, in_p).reshape(nb, tb, in_p)
    x2p = pad2(x2.astype(f32), bp, in_p).reshape(nb, tb, in_p)
    xs = jnp.concatenate([x1p, x2p], axis=1).astype(bf16)    # (nb, 2*tb, in_p)

    w1p = pad2(w1.astype(f32), in_p, mid_p).astype(bf16)
    w2p = pad2(w2.astype(f32), mid_p, out_p).astype(bf16)
    b1p = pad2(b1.reshape(1, -1).astype(f32), 1, mid_p)
    b2p = pad2(b2.reshape(1, -1).astype(f32), 1, out_p)

    kernel = functools.partial(deep_dot_kernel, tb=tb, batch=batch)

    flops = 2 * (2 * bp) * (in_p * mid_p + mid_p * out_p)
    bytes_accessed = (xs.size * 2 + w1p.size * 2 + w2p.size * 2
                      + b1p.size * 4 + b2p.size * 4 + nb * 8 * out_p * 4)

    partials = pl.pallas_call(
        kernel,
        out_shape=jax.ShapeDtypeStruct((nb * 8, out_p), jnp.float32),
        grid_spec=pltpu.PrefetchScalarGridSpec(
            num_scalar_prefetch=0,
            grid=(nb,),
            in_specs=[
                # stacked [x1; x2] batch tile, streamed + double-buffered
                pl.BlockSpec((None, 2 * tb, in_p), lambda i: (i, 0, 0)),
                # weights / biases: constant index_map -> VMEM-resident
                pl.BlockSpec((in_p, mid_p), lambda i: (0, 0)),
                pl.BlockSpec((1, mid_p), lambda i: (0, 0)),
                pl.BlockSpec((mid_p, out_p), lambda i: (0, 0)),
                pl.BlockSpec((1, out_p), lambda i: (0, 0)),
            ],
            out_specs=pl.BlockSpec((8, out_p), lambda i: (i, 0)),
        ),
        compiler_params=pltpu.CompilerParams(
            dimension_semantics=("parallel",),
            vmem_limit_bytes=32 * 1024 * 1024,
        ),
        cost_estimate=pl.CostEstimate(
            flops=flops, transcendentals=0, bytes_accessed=bytes_accessed),
    )(xs, w1p, b1p, w2p, b2p)

    # Tiny one-time cross-lane reduction + hoisted 1/B scale (no divide in-kernel).
    return jnp.sum(partials) * (1.0 / batch)


def reference(x1, x2, w1, b1, w2, b2):
    def encode(x):
        h = jnp.maximum(x @ w1 + b1, 0.0)
        return h @ w2 + b2
    z1, z2 = encode(x1), encode(x2)
    return jnp.dot(z1.reshape(-1), z2.reshape(-1)) / x1.shape[0]


if __name__ == "__main__":
    # Small shapes consistent with the module's forward:
    #   x1, x2 : (batch, in_dim);  Encoder: in_dim -> mid_layers -> out_dim
    batch, in_dim, mid_layers, out_dim = 16, 32, 64, 16

    key = jax.random.PRNGKey(0)
    k_x1, k_x2, k_w1, k_b1, k_w2, k_b2 = jax.random.split(key, 6)

    x1 = jax.random.normal(k_x1, (batch, in_dim), dtype=jnp.float32)
    x2 = jax.random.normal(k_x2, (batch, in_dim), dtype=jnp.float32)

    # Deterministic parameter init (synthetic; no checkpoint loading).
    w1 = jax.random.normal(k_w1, (in_dim, mid_layers), dtype=jnp.float32) * 0.1
    b1 = jax.random.normal(k_b1, (1, mid_layers), dtype=jnp.float32) * 0.1
    w2 = jax.random.normal(k_w2, (mid_layers, out_dim), dtype=jnp.float32) * 0.1
    b2 = jax.random.normal(k_b2, (1, out_dim), dtype=jnp.float32) * 0.1

    # tb=8 -> grid of 2 batch tiles (exercises the pipelined/tiled path).
    out = deep_dot(x1, x2, w1, b1, w2, b2, tb=8)
    out = jax.block_until_ready(out)

    ref = reference(x1, x2, w1, b1, w2, b2)
    # Tolerance loosened vs. the pure-f32 reference because the kernel streams
    # bf16 matmul operands (f32 accumulation keeps the error small & bounded).
    assert jnp.allclose(out, ref, rtol=5e-2, atol=2e-2), (out, ref)

    print("KERNEL_OK")
</pallas_src>

<mosaic_0001>
module attributes {stable_mosaic.version = 11 : i64} {
  func.func @deep_dot_kernel(%arg0: i32, %arg1: memref<1x16x128xbf16, #tpu.memory_space<vmem>>, %arg2: memref<128x128xbf16, #tpu.memory_space<vmem>>, %arg3: memref<1x128xf32, #tpu.memory_space<vmem>>, %arg4: memref<128x128xbf16, #tpu.memory_space<vmem>>, %arg5: memref<1x128xf32, #tpu.memory_space<vmem>>, %arg6: memref<8x128xf32, #tpu.memory_space<vmem>>) attributes {dimension_semantics = [#tpu.dimension_semantics<parallel>], iteration_bounds = array<i64: 2>, scalar_prefetch = 0 : i64, scratch_operands = 0 : i64, tpu.core_type = #tpu.core_type<tc>, window_params = [{transform_indices = @transform_0, window_bounds = array<i64: 1, 16, 128>}, {pipeline_mode = #tpu.pipeline_mode<synchronous>, transform_indices = @transform_1, window_bounds = array<i64: 128, 128>}, {pipeline_mode = #tpu.pipeline_mode<synchronous>, transform_indices = @transform_2, window_bounds = array<i64: 1, 128>}, {pipeline_mode = #tpu.pipeline_mode<synchronous>, transform_indices = @transform_3, window_bounds = array<i64: 128, 128>}, {pipeline_mode = #tpu.pipeline_mode<synchronous>, transform_indices = @transform_4, window_bounds = array<i64: 1, 128>}, {transform_indices = @transform_5, window_bounds = array<i64: 8, 128>}]} {
    %c0 = arith.constant 0 : index
    %c0_0 = arith.constant 0 : index
    %c0_1 = arith.constant 0 : index
    %0 = vector.load %arg1[%c0, %c0_0, %c0_1] : memref<1x16x128xbf16, #tpu.memory_space<vmem>>, vector<1x16x128xbf16>
    %1 = vector.shape_cast %0 : vector<1x16x128xbf16> to vector<16x128xbf16>
    %c0_2 = arith.constant 0 : index
    %c0_3 = arith.constant 0 : index
    %2 = vector.load %arg2[%c0_2, %c0_3] : memref<128x128xbf16, #tpu.memory_space<vmem>>, vector<128x128xbf16>
    %cst = arith.constant dense<0.000000e+00> : vector<16x128xf32>
    %3 = tpu.matmul %1, %2, %cst {dimension_numbers = #tpu.dot_dimension_numbers<[1], [0], [0], [1], [0, 0, 1, 1], [], []>} : vector<16x128xbf16>, vector<128x128xbf16>, vector<16x128xf32> -> vector<16x128xf32>
    %c0_4 = arith.constant 0 : index
    %c0_5 = arith.constant 0 : index
    %4 = vector.load %arg3[%c0_4, %c0_5] : memref<1x128xf32, #tpu.memory_space<vmem>>, vector<1x128xf32>
    %5 = vector.broadcast %4 : vector<1x128xf32> to vector<16x128xf32>
    %6 = arith.addf %3, %5 : vector<16x128xf32>
    %cst_6 = arith.constant 0.000000e+00 : f32
    %7 = vector.broadcast %cst_6 : f32 to vector<16x128xf32>
    %8 = arith.maximumf %6, %7 : vector<16x128xf32>
    %9 = arith.truncf %8 : vector<16x128xf32> to vector<16x128xbf16>
    %c0_7 = arith.constant 0 : index
    %c0_8 = arith.constant 0 : index
    %10 = vector.load %arg4[%c0_7, %c0_8] : memref<128x128xbf16, #tpu.memory_space<vmem>>, vector<128x128xbf16>
    %cst_9 = arith.constant dense<0.000000e+00> : vector<16x128xf32>
    %11 = tpu.matmul %9, %10, %cst_9 {dimension_numbers = #tpu.dot_dimension_numbers<[1], [0], [0], [1], [0, 0, 1, 1], [], []>} : vector<16x128xbf16>, vector<128x128xbf16>, vector<16x128xf32> -> vector<16x128xf32>
    %c0_10 = arith.constant 0 : index
    %c0_11 = arith.constant 0 : index
    %12 = vector.load %arg5[%c0_10, %c0_11] : memref<1x128xf32, #tpu.memory_space<vmem>>, vector<1x128xf32>
    %13 = vector.broadcast %12 : vector<1x128xf32> to vector<16x128xf32>
    %14 = arith.addf %11, %13 : vector<16x128xf32>
    %15 = vector.extract_strided_slice %14 {offsets = [0, 0], sizes = [8, 128], strides = [1, 1]} : vector<16x128xf32> to vector<8x128xf32>
    %16 = vector.extract_strided_slice %14 {offsets = [8, 0], sizes = [8, 128], strides = [1, 1]} : vector<16x128xf32> to vector<8x128xf32>
    %17 = arith.mulf %15, %16 : vector<8x128xf32>
    %18 = vector.shape_cast %17 : vector<8x128xf32> to vector<1x8x128xf32>
    %cst_12 = arith.constant dense<0.000000e+00> : vector<8x128xf32>
    %19 = vector.multi_reduction <add>, %18, %cst_12 [0] : vector<1x8x128xf32> to vector<8x128xf32>
    %c0_13 = arith.constant 0 : index
    %c0_14 = arith.constant 0 : index
    %20 = vector.load %arg6[%c0_13, %c0_14] : memref<8x128xf32, #tpu.memory_space<vmem>>, vector<8x128xf32>
    tpu.vector_store %arg6[%c0_13, %c0_14], %19 {strides = array<i32>} : memref<8x128xf32, #tpu.memory_space<vmem>>, vector<8x128xf32>,
    return
  }
  func.func @transform_0(%arg0: i32) -> (i32, i32, i32) {
    %c0_i32 = arith.constant 0 : i32
    %c0_i32_0 = arith.constant 0 : i32
    %c0_i32_1 = arith.constant 0 : i32
    return %arg0, %c0_i32, %c0_i32_0 : i32, i32, i32
  }
  func.func @transform_1(%arg0: i32) -> (i32, i32) {
    %c0_i32 = arith.constant 0 : i32
    %c0_i32_0 = arith.constant 0 : i32
    %c0_i32_1 = arith.constant 0 : i32
    return %c0_i32, %c0_i32_0 : i32, i32
  }
  func.func @transform_2(%arg0: i32) -> (i32, i32) {
    %c0_i32 = arith.constant 0 : i32
    %c0_i32_0 = arith.constant 0 : i32
    %c0_i32_1 = arith.constant 0 : i32
    return %c0_i32, %c0_i32_0 : i32, i32
  }
  func.func @transform_3(%arg0: i32) -> (i32, i32) {
    %c0_i32 = arith.constant 0 : i32
    %c0_i32_0 = arith.constant 0 : i32
    %c0_i32_1 = arith.constant 0 : i32
    return %c0_i32, %c0_i32_0 : i32, i32
  }
  func.func @transform_4(%arg0: i32) -> (i32, i32) {
    %c0_i32 = arith.constant 0 : i32
    %c0_i32_0 = arith.constant 0 : i32
    %c0_i32_1 = arith.constant 0 : i32
    return %c0_i32, %c0_i32_0 : i32, i32
  }
  func.func @transform_5(%arg0: i32) -> (i32, i32) {
    %c0_i32 = arith.constant 0 : i32
    %c0_i32_0 = arith.constant 0 : i32
    return %arg0, %c0_i32 : i32, i32
  }
}

</mosaic_0001>

<bundles_post_ra>
// kernel: tpu_custom_call.1
= control target key start
LH: loop header
LB: loop body
LE: loop exit
PB: predicated region body
PF: predicated region fallthrough
CT: control target
= control target key end

     0   :  { %10 = vsyncpa [#allocation3], 0  ;;  %s1247_s0 = inlined_call_operand.hbm [shape: bf16[2,16,128], index: 0, kind: input, shape index: {}]   ;;  %s1248_s1 = inlined_call_operand.hbm [shape: bf16[128,128], index: 1, kind: input, shape index: {}]   ;;  %s1249_s2 = inlined_call_operand.vmem [shape: f32[1,128], index: 2, kind: input, shape index: {}]   ;;  %s1250_s3 = inlined_call_operand.hbm [shape: bf16[128,128], index: 3, kind: input, shape index: {}]   ;;  %s1251_s4 = inlined_call_operand.vmem [shape: f32[1,128], index: 4, kind: input, shape index: {}]   ;;  %s1252_s5 = inlined_call_operand.hbm [shape: f32[16,128], index: 5, kind: output, shape index: {}]  }
   0x1   :  { %12 = vsyncpa [#allocation3 + $0x1], 0 }
   0x2   :  { %13 = vsyncpa [#allocation6], 0 }
   0x3   :  { %14 = vsyncpa [#allocation4], 0 }
   0x4   :  { %16 = vsyncpa [#allocation4 + $0x1], 0  ;;  %s993_s18 = smov 0   ;;  %s995_s19 = smov 0  }
   0x5   :  { %s997_s20 = smov 0   ;;  %s999_s21 = smov 0  }
   0x6 LB: > { %s1014_s22 = sadd.s32 4294967295, %s953_s21   ;;  %s614_s23 = sadd.s32 4294967294, %s953_s21   ;;  %s953_s21 = sphi %s999_s21, %s1272_s21   ;;  %s949_s20 = sphi %s997_s20, %s1271_s20   ;;  %s945_s19 = sphi %s995_s19, %s1270_s19   ;;  %s941_s18 = sphi %s993_s18, %s1269_s18  }
   0x7   : > { %p42_p0 = scmp.ne.s32.totalorder %s945_s19, %s941_s18  ;;  %p1253_p1 = scmp.eq.s32.totalorder %s1014_s22, 0 }
   0x8   : > { %p156_p3 = scmp.eq.s32.totalorder %s614_s23, 1  ;;  %p615_p5 = scmp.ge.s32.totalorder %s953_s21, 1 }
   0x9   : > { %p1023_p4 = por %p1253_p1, %p42_p0  ;;  %p163_p7 = scmp.lt.s32.totalorder %s953_s21, 3 }
   0xa   : > { %p1028_p6 = por %p156_p3, %p42_p0  ;;  %s955_s27 = smov [#allocation5]  }
   0xb   : > { %s1256_s24 = scalar_select %p1023_p4, 1, 0 }
   0xc   : > { %s1257_s25 = scalar_select %p1028_p6, 1, 0 }
   0xd   : > { %p1033_p8 = pnand %p615_p5, %p163_p7  ;;  %s175_s28 = sshll.u32 %s955_s27, 4  ;;  %s1037_s28 = int_to_ptr.vmem [resolvable:$true] %s175_s28 }
   0xe   : > { %s956_s30 = smov [#allocation7]   ;;  %s797_s9 = scalar_lea.hbm %s1248_s1, 1024 }
   0xf   : > { %p721_p9 = pneg %p1033_p8  ;;  %s191_s6 = sshll.u32 %s956_s30, 4  ;;  %s1048_s6 = int_to_ptr.vmem [resolvable:$true] %s191_s6 }
  0x10   : > { %p798_p12 = scmp.ne.s32.totalorder %s1248_s1, %s797_s9  ;;  %p804_p5 = scmp.lt.u32.totalorder %s797_s9, %s1248_s1 }
  0x11   : > { %p1044_p11 = pnand %p721_p9, %p1253_p1 }
  0x13   : > { %p799_p13 = pneg %p1044_p11 }
  0x15   : > { %p800_p0 = pnand %p799_p13, %p798_p12 }
  0x17   : > { %p801_p3 = pneg %p800_p0 }
  0x19   : > { %p806_p7 = pnand %p804_p5, %p801_p3 }
  0x1b   : > { %809 = shalt.err (!%p806_p7)
}
  0x1c   : > { %s810_s14 = scalar_lea.vmem %s1037_s28, 1024  ;;  %p818_p2 = scmp.lt.s32.totalorder %s1037_s28, %s1037_s28 }
  0x1d   : > { %p811_p9 = scmp.ne.s32.totalorder %s1037_s28, %s810_s14  ;;  %p819_p12 = scmp.lt.s32.totalorder %s810_s14, %s810_s14 }
  0x1f   : > { %p813_p10 = pnand %p811_p9, %p799_p13  ;;  %p820_p0 = por %p819_p12, %p818_p2 }
  0x21   : > { %p814_p1 = pneg %p813_p10 }
  0x23   : > { %p821_p6 = pnand %p820_p0, %p814_p1 }
  0x25   : > { %824 = shalt.err (!%p821_p6)
}
  0x26   : > { %s957_s15 = smov 64   ;;  %s958_s16 = smov 4  }
  0x27   : > { %724 = dma.hbm_to_vmem [thread:$0]  (!%p1044_p11), %s1248_s1, 1024, %s1037_s28, [#allocation6], %s957_s15, %s957_s15, %s958_s16  }
  0x28   : > { %s825_s7 = scalar_lea.hbm %s1250_s3, 1024 }
  0x29   : > { %p826_p1 = scmp.ne.s32.totalorder %s1250_s3, %s825_s7  ;;  %p832_p10 = scmp.lt.u32.totalorder %s825_s7, %s1250_s3 }
  0x2b   : > { %p828_p2 = pnand %p826_p1, %p799_p13 }
  0x2d   : > { %p829_p6 = pneg %p828_p2 }
  0x2f   : > { %p834_p3 = pnand %p832_p10, %p829_p6 }
  0x31   : > { %837 = shalt.err (!%p834_p3)
}
  0x32   : > { %s838_s28 = scalar_lea.vmem %s1048_s6, 1024  ;;  %p846_p12 = scmp.lt.s32.totalorder %s1048_s6, %s1048_s6 }
  0x33   : > { %p839_p5 = scmp.ne.s32.totalorder %s1048_s6, %s838_s28  ;;  %p847_p0 = scmp.lt.s32.totalorder %s838_s28, %s838_s28 }
  0x35   : > { %p841_p7 = pnand %p839_p5, %p799_p13  ;;  %p848_p1 = por %p847_p0, %p846_p12 }
  0x37   : > { %p842_p9 = pneg %p841_p7 }
  0x39   : > { %p849_p2 = pnand %p848_p1, %p842_p9 }
  0x3b   : > { %852 = shalt.err (!%p849_p2)
}
  0x3c   : > { %727 = dma.hbm_to_vmem [thread:$0]  (!%p1044_p11), %s1250_s3, 1024, %s1048_s6, [#allocation6], %s957_s15, %s957_s15, %s958_s16  }
  0x3d   : > { %s1109_s29 = sadd.s32 1, %s953_s21   ;;  %s29_s14 = sadd.s32 1, %s949_s20 }
  0x3e   : > { %s26_s17 = ssub.s32 %s953_s21, %s1109_s29  ;;  %p36_p13 = scmp.ne.s32.totalorder %s949_s20, %s945_s19 }
  0x3f   : > { %p27_p6 = scmp.eq.s32.totalorder %s26_s17, 0  ;;  %p37_p10 = scmp.eq.s32.totalorder %s953_s21, 0 }
  0x40   : > { %p1260_p3 = scmp.eq.s32.totalorder %s1014_s22, 1  ;;  %p738_p7 = scmp.lt.s32.totalorder %s953_s21, 2 }
  0x41   : > { %s1125_s27 = scalar_select %p27_p6, %s949_s20, %s29_s14  }
  0x42   : > { %p1119_p5 = por %p1260_p3, %p36_p13  ;;  %p38_p9 = por %p37_p10, %p36_p13 }
  0x43   : > { %s208_s30 = sand.u32 1, %s949_s20   ;;  %s650_s6 = sshll.u32 %s953_s21, 7 }
  0x44   : > { %s1261_s23 = scalar_select %p1119_p5, 1, 0 }
  0x45   : > { %s619_s7 = sshll.u32 %s208_s30, 3  ;;  %s1132_s10 = scalar_lea.hbm %s1247_s0, %s650_s6 }
  0x46   : > { %s212_s11 = scalar_lea.vmem [#allocation2], %s619_s7  ;;  %p1136_p11 = pnand %p738_p7, %p38_p9 }
  0x47   : > { %s219_s28 = sshll.u32 %s212_s11, 4  ;;  %s1140_s13 = scalar_lea.sflag [#allocation3], %s208_s30  ;;  %s1134_s28 = int_to_ptr.vmem [resolvable:$true] %s219_s28 }
  0x48   : > { %s853_s14 = scalar_lea.hbm %s1132_s10, 128  ;;  %p855_p0 = pneg %p1136_p11 }
  0x49   : > { %p854_p12 = scmp.ne.s32.totalorder %s1132_s10, %s853_s14  ;;  %s858_s6 = scalar_lea.hbm %s1247_s0, 256 }
  0x4a   : > { %p859_p13 = scmp.lt.u32.totalorder %s1132_s10, %s1247_s0  ;;  %p860_p6 = scmp.lt.u32.totalorder %s858_s6, %s853_s14 }
  0x4b   : > { %p856_p1 = pnand %p855_p0, %p854_p12  ;;  %p862_p3 = scmp.lt.u32.totalorder %s853_s14, %s1132_s10 }
  0x4c   : > { %p861_p10 = por %p860_p6, %p859_p13 }
  0x4d   : > { %p857_p2 = pneg %p856_p1 }
  0x4e   : > { %p863_p7 = por %p862_p3, %p861_p10 }
  0x50   : > { %p864_p9 = pnand %p863_p7, %p857_p2 }
  0x52   : > { %867 = shalt.err (!%p864_p9)
}
  0x53   : > { %s868_s30 = scalar_lea.vmem %s1134_s28, 128  ;;  %s959_s11 = smov [#allocation2]  }
  0x54   : > { %p869_p12 = scmp.ne.s32.totalorder %s1134_s28, %s868_s30  ;;  %s873_s17 = sshll.u32 %s959_s11, 4  ;;  %s874_s17 = int_to_ptr.vmem [resolvable:$false] %s873_s17 }
  0x55   : > { %s875_s7 = scalar_lea.vmem %s874_s17, 256  ;;  %p876_p4 = scmp.lt.s32.totalorder %s1134_s28, %s874_s17 }
  0x56   : > { %p871_p1 = pnand %p869_p12, %p855_p0  ;;  %p877_p13 = scmp.lt.s32.totalorder %s875_s7, %s868_s30 }
  0x58   : > { %p872_p5 = pneg %p871_p1  ;;  %p878_p6 = por %p877_p13, %p876_p4 }
  0x5a   : > { %p879_p10 = pnand %p878_p6, %p872_p5 }
  0x5c   : > { %882 = shalt.err (!%p879_p10)
}
  0x5d   : > { %731 = dma.hbm_to_vmem [thread:$0]  (!%p1136_p11), %s1132_s10, 128, %s1134_s28, %s1140_s13, %s957_s15, %s957_s15, %s958_s16  }
  0x5e   : > { %231 = sbr.rel (%p1033_p8) target bundleno = 591 (0x24f), region = 40  ;;  %s1174_s14 = sand.u32 (!%p1033_p8), 1, %s945_s19  }
  0x5f   : > { %s623_s6 = sshll.u32 (!%p1033_p8), %s1174_s14, 3  ;;  %s234_s8 = scalar_lea.sflag (!%p1033_p8), [#allocation3], %s1174_s14 }
  0x60   : > { %s1180_s12 = scalar_lea.vmem (!%p1033_p8), [#allocation2], %s623_s6  ;;  %p1263_p4 = scmp.ne.s32.totalorder (!%p1033_p8), %s1256_s24, 0 }
  0x65   : > { %928 = dma.done.wait (%p1263_p4), %s234_s8, 128  }
  0x66   : > { %930 = vsyncadd (%p1263_p4), %s234_s8, 4294967168  ;;  %p1264_p5 = scmp.eq.s32.totalorder %s1014_s22, 0 }
  0x68   : > { %932 = dma.done.wait (%p1264_p5), [#allocation6], 2048   ;;  %p1265_p8 = pmov %p1264_p5 }
  0x69   : > { %v960_v0 = vmov 0.0   ;;  %vm961_vm0 = vmmov 0   ;;  %v780_v1 = vld [vmem:[#allocation5] sm:$0xff]   ;;  %v781_v2 = vld [vmem:[#allocation5 + $0x8] sm:$0xff]   ;;  %v782_v3 = vld [vmem:[#allocation5 + $0x10] sm:$0xff]   ;;  %s647_s10 = sshll.u32 %s1014_s22, 7 }
  0x6a   : > { %934 = vsyncadd (%p1265_p8), [#allocation6], 4294965248  ;;  %669 = vmatprep.subr.bf16.mxu0 %v960_v0  ;;  %685 = vmatprep.mubr.msk.bf16.mxu0 %vm961_vm0, %v960_v0  ;;  %v789_v4 = vld [vmem:[#allocation7] sm:$0xff]   ;;  %v783_v5 = vld [vmem:[#allocation5 + $0x18] sm:$0xff]   ;;  %s271_s28 = scalar_lea.vmem [#allocation8], %s623_s6  ;;  %s1203_s11 = scalar_lea.hbm %s1252_s5, %s647_s10 }
  0x6b   : > { %689 = vmatprep.subr.bf16.mxu1 %v960_v0  ;;  %705 = vmatprep.mubr.msk.bf16.mxu1 %vm961_vm0, %v960_v0  ;;  %v790_v6 = vld [vmem:[#allocation7 + $0x8] sm:$0xff]   ;;  %v784_v7 = vld [vmem:[#allocation5 + $0x20] sm:$0xff]   ;;  %v791_v8 = vld [vmem:[#allocation7 + $0x10] sm:$0xff]   ;;  %s525_s13 = sshll.u32 %s271_s28, 4  ;;  %s512_s17 = scalar_lea.sflag [#allocation4], %s1174_s14  ;;  %s1205_s13 = int_to_ptr.vmem [resolvable:$true] %s525_s13 }
  0x6c   : > { %670 = vmatpush3.bf16.msra.mxu0 %v780_v1  ;;  %690 = vmatpush3.bf16.msra.mxu1 %v789_v4  ;;  %v785_v9 = vld [vmem:[#allocation5 + $0x28] sm:$0xff]   ;;  %v792_v10 = vld [vmem:[#allocation7 + $0x18] sm:$0xff]   ;;  %v786_v11 = vld [vmem:[#allocation5 + $0x30] sm:$0xff]   ;;  %s883_s22 = scalar_lea.vmem %s1205_s13, 128  ;;  %p1266_p0 = scmp.ne.s32.totalorder %s1261_s23, 0 }
  0x6d   : > { %671 = vmatprep.subr.bf16.mxu0 %v960_v0  ;;  %691 = vmatprep.subr.bf16.mxu1 %v960_v0  ;;  %v793_v12 = vld [vmem:[#allocation7 + $0x20] sm:$0xff]   ;;  %v787_v13 = vld [vmem:[#allocation5 + $0x38] sm:$0xff]   ;;  %v794_v14 = vld [vmem:[#allocation7 + $0x28] sm:$0xff]   ;;  %p884_p11 = scmp.ne.s32.totalorder %s1205_s13, %s883_s22  ;;  %s962_s7 = smov [#allocation8]  }
  0x6e   : > { %v788_v15 = vld [vmem:[%s1180_s12] sm:$0xff]   ;;  %s887_s6 = sshll.u32 %s962_s7, 4  ;;  %s888_s6 = int_to_ptr.vmem [resolvable:$false] %s887_s6 }
  0x6f   : > { %v795_v16 = vld [vmem:[#allocation7 + $0x30] sm:$0xff]   ;;  %v796_v17 = vld [vmem:[#allocation7 + $0x38] sm:$0xff]   ;;  %p885_p2 = pnand %p884_p11, %p1266_p0  ;;  %s889_s8 = scalar_lea.vmem %s888_s6, 256 }
  0x70   : > { %672 = vmatpush3.bf16.msra.mxu0 %v781_v2  ;;  %692 = vmatpush3.bf16.msra.mxu1 %v790_v6  ;;  %v627_v18 = vld [vmem:[%s1249_s2] ss:$0 sm:$0xff]  ;;  %p890_p7 = scmp.lt.s32.totalorder %s1205_s13, %s888_s6  ;;  %p891_p9 = scmp.lt.s32.totalorder %s889_s8, %s883_s22 }
  0x71   : > { %673 = vmatprep.subr.bf16.mxu0 %v960_v0  ;;  %693 = vmatprep.subr.bf16.mxu1 %v960_v0  ;;  %v637_v28 = vld [vmem:[%s1251_s4] ss:$0 sm:$0xff]  ;;  %p886_p3 = pneg %p885_p2 }
  0x72   : > { %p892_p12 = por %p891_p9, %p890_p7 }
  0x74   : > { %674 = vmatpush3.bf16.msra.mxu0 %v782_v3  ;;  %694 = vmatpush3.bf16.msra.mxu1 %v791_v8  ;;  %p893_p1 = pnand %p892_p12, %p886_p3 }
  0x75   : > { %675 = vmatprep.subr.bf16.mxu0 %v960_v0  ;;  %695 = vmatprep.subr.bf16.mxu1 %v960_v0 }
  0x78   : > { %676 = vmatpush3.bf16.msra.mxu0 %v783_v5  ;;  %696 = vmatpush3.bf16.msra.mxu1 %v792_v10 }
  0x79   : > { %677 = vmatprep.subr.bf16.mxu0 %v960_v0  ;;  %697 = vmatprep.subr.bf16.mxu1 %v960_v0 }
  0x7c   : > { %678 = vmatpush3.bf16.msra.mxu0 %v784_v7  ;;  %698 = vmatpush3.bf16.msra.mxu1 %v793_v12 }
  0x7d   : > { %679 = vmatprep.subr.bf16.mxu0 %v960_v0  ;;  %699 = vmatprep.subr.bf16.mxu1 %v960_v0 }
  0x80   : > { %680 = vmatpush3.bf16.msra.mxu0 %v785_v9  ;;  %700 = vmatpush3.bf16.msra.mxu1 %v794_v14 }
  0x81   : > { %681 = vmatprep.subr.bf16.mxu0 %v960_v0  ;;  %701 = vmatprep.subr.bf16.mxu1 %v960_v0 }
  0x84   : > { %682 = vmatpush3.bf16.msra.mxu0 %v786_v11  ;;  %702 = vmatpush3.bf16.msra.mxu1 %v795_v16 }
  0x85   : > { %683 = vmatprep.subr.bf16.mxu0 %v960_v0  ;;  %703 = vmatprep.subr.bf16.mxu1 %v960_v0 }
  0x88   : > { %684 = vmatpush3.bf16.msra.mxu0 %v787_v13  ;;  %704 = vmatpush3.bf16.msra.mxu1 %v796_v17 }
  0x8b   : > { %686 = vmatmul.mubr.bf16.vlgmr.msra.gmra.mrb[0].mxu0 %v788_v15 }
 0x15e   : > { %v386_v19 = vpop.f32.mrb[0].mxu0 }
 0x15f   : > { %v387_v20 = vadd.f32 %v627_v18, %v386_v19  ;;  %v687_v21 = vpop.f32.mrb[1].mxu0 }
 0x160   : > { %v389_v22 = vpop.f32.mrb[2].mxu0 }
 0x161   : > { %v390_v23 = vadd.f32 %v627_v18, %v389_v22  ;;  %v688_v24 = vpop.f32.mrb[3].mxu0  ;;  %v393_v25 = vmax.f32 %v387_v20, 0.0 }
 0x163   : > { %v394_v26 = vmax.f32 %v390_v23, 0.0 }
 0x165   : > { %v395_v27 = vpack.c.bf16 %v394_v26, %v393_v25 }
 0x167   : > { %706 = vmatmul.mubr.bf16.vlgmr.msra.gmra.mrb[0].mxu1 %v395_v27 }
 0x23a   : > { %v501_v29 = vpop.f32.mrb[0].mxu1 }
 0x23b   : > { %v707_v30 = vpop.f32.mrb[1].mxu1  ;;  %v502_v32 = vadd.f32 %v637_v28, %v501_v29 }
 0x23c   : > { %v504_v31 = vpop.f32.mrb[2].mxu1 }
 0x23d   : > { %v505_v33 = vadd.f32 %v637_v28, %v504_v31  ;;  %v708_v34 = vpop.f32.mrb[3].mxu1 }
 0x23f   : > { %v508_v35 = vmul.f32 %v505_v33, %v502_v32 }
 0x241   : > { %510 = vst [vmem:[%s271_s28] sm:$0xff] %v508_v35 }
 0x242   : > { %896 = shalt.err (!%p893_p1)
}
 0x243   : > { %s897_s14 = scalar_lea.hbm %s1203_s11, 128  ;;  %s901_s26 = scalar_lea.hbm %s1252_s5, 256 }
 0x244   : > { %p898_p13 = scmp.ne.s32.totalorder %s1203_s11, %s897_s14  ;;  %p902_p4 = scmp.lt.u32.totalorder %s1203_s11, %s1252_s5 }
 0x245   : > { %p903_p5 = scmp.lt.u32.totalorder %s901_s26, %s897_s14  ;;  %p905_p11 = scmp.lt.u32.totalorder %s897_s14, %s1203_s11 }
 0x246   : > { %p899_p6 = pnand %p898_p13, %p1266_p0 }
 0x247   : > { %p904_p8 = por %p903_p5, %p902_p4 }
 0x248   : > { %p900_p10 = pneg %p899_p6 }
 0x249   : > { %p906_p2 = por %p905_p11, %p904_p8 }
 0x24b   : > { %p907_p3 = pnand %p906_p2, %p900_p10 }
 0x24d   : > { %910 = shalt.err (!%p907_p3)
}
 0x24e   : > { %719 = dma.vmem_to_hbm [thread:$0]  (%p1266_p0), %s1205_s13, 128, %s1203_s11, %s512_s17  }
 0x24f PF: > { %s537_s10 = sand.u32 1, %s941_s18   ;;  %p1267_p7 = scmp.ne.s32.totalorder %s1257_s25, 0 }
 0x250   : > { %p1268_p9 = scmp.ge.s32.totalorder %s953_s21, 2  ;;  %s538_s28 = scalar_lea.sflag [#allocation4], %s537_s10 }
 0x252   : > { %p733_p12 = pnand %p1268_p9, %p1267_p7 }
 0x254   : > { %936 = dma.done.wait (!%p733_p12), %s538_s28, 128  }
 0x255   : > { %938 = vsyncadd (!%p733_p12), %s538_s28, 4294967168  ;;  %p19_p1 = scmp.ge.s32.totalorder %s1109_s29, 4   ;;  %s1269_s18 = smov %s945_s19 }
 0x256   : > { %s1270_s19 = smov %s949_s20  ;;  %s1271_s20 = smov %s1125_s27 }
 0x257   : > { %s1272_s21 = smov %s1109_s29  ;;  %21 = sbr.rel (!%p19_p1) target bundleno = 6 (0x6), region = 93 }
 0x25e   :  { %543 = vsyncpa [#allocation3], 1 }
 0x25f   :  { %545 = vsyncpa [#allocation3 + $0x1], 1 }
 0x260   :  { %546 = vsyncpa [#allocation6], 1 }
 0x261   :  { %547 = vsyncpa [#allocation4], 1 }
 0x262   :  { %549 = vsyncpa [#allocation4 + $0x1], 1 }

</bundles_post_ra>
